<compile_context>
chip_gen: v5e
topology: v5e:2x2
jax: 0.10.0
libtpu: 0.0.40
codegen_flags: <defaults>
</compile_context>

<pallas_src>
import jax
import jax.numpy as jnp
from jax.experimental import pallas as pl
from jax.experimental.pallas import tpu as pltpu


_HEAD_W = 128      # lane-dense fused head width (one full vreg of lanes)
_SCALE_OFF = 64    # lane-aligned start of the scale half inside the head


def _combiner_kernel(z_ref, u_ref, h1_ref, h2_ref,
                     wz_ref, bz_ref, wbig_ref, bh_ref,
                     out_ref):
    # ---- tanh(z @ Wz + bz)  (tanh runs on the EUP slot) ---------------------
    hz = jnp.tanh(
        jnp.dot(z_ref[...], wz_ref[...], preferred_element_type=jnp.float32)
        + bz_ref[...])

    # ---- h_combined = 1/3 (hz + h_rnn_1 + h_rnn_2); relu --------------------
    hr = jnp.maximum((hz + h1_ref[...] + h2_ref[...]) * (1.0 / 3.0), 0.0)

    # ---- single fused head matmul over the lane-concat [hr | u_t] -----------
    #   W_big = [ [W_loc|0|W_scale|0] ; [Bd^T|0|0|0] ]   (rnn_dim+u_dim, 128)
    x_head = jnp.concatenate([hr, u_ref[...]], axis=1)      # (tb, rnn+u)
    head = (jnp.dot(x_head, wbig_ref[...], preferred_element_type=jnp.float32)
            + bh_ref[...])                                   # (tb, 128)

    # ---- softplus only selected on the scale half (padded lanes are exactly
    #      0 from the zero weight columns, so exp/log1p there is benign) ------
    sp = jnp.maximum(head, 0.0) + jnp.log1p(jnp.exp(-jnp.abs(head)))
    lane = jax.lax.broadcasted_iota(jnp.int32, head.shape, dimension=1)
    out_ref[...] = jnp.where(lane >= _SCALE_OFF, sp, head).astype(out_ref.dtype)


def prepare_combiner_params(params):
    """One-time weight prep (call OUTSIDE the per-step / scan hot path).

    params: (wz, bz, wl, bl, ws, bs, bd_t) with linear weights stored as
            (in_features, out_features); bd_t = Bd^T of shape (u_dim, z_dim).
    Returns (wz, bz_row, w_big, b_head) with the fused, lane-padded head.
    """
    wz, bz, wl, bl, ws, bs, bd_t = params
    z_dim, rnn_dim = wz.shape
    u_dim = bd_t.shape[0]
    assert z_dim <= _SCALE_OFF, "head layout assumes z_dim <= 64"

    w_big = jnp.zeros((rnn_dim + u_dim, _HEAD_W), jnp.float32)
    w_big = w_big.at[:rnn_dim, :z_dim].set(wl)                            # loc head
    w_big = w_big.at[:rnn_dim, _SCALE_OFF:_SCALE_OFF + z_dim].set(ws)     # scale head
    w_big = w_big.at[rnn_dim:, :z_dim].set(bd_t)                          # u -> loc only

    b_head = jnp.zeros((1, _HEAD_W), jnp.float32)
    b_head = b_head.at[0, :z_dim].set(bl)
    b_head = b_head.at[0, _SCALE_OFF:_SCALE_OFF + z_dim].set(bs)

    return (wz, bz.reshape(1, rnn_dim), w_big, b_head)


def _choose_tile_b(B, z_dim, u_dim, rnn_dim):
    """Batch tile: VMEM-capped, multiple of 8, >=2 grid steps when B >= 16."""
    # Conservative VMEM budget for the double-buffered per-row tiles
    # (safe on every generation incl. v7x's 64 MiB physical / 32 MiB scoped).
    budget = 6 * 1024 * 1024
    bytes_per_row = 4 * 2 * (z_dim + u_dim + 2 * rnn_dim + _HEAD_W)   # 2x = dbl buffer
    cap = max(8, (budget // bytes_per_row) // 8 * 8)

    tile_b = min(B, cap)
    if B >= 16:
        # at least 2 grid steps: pipelining + megacore sharding on v7x
        half = max(8, (B // 2) // 8 * 8)
        tile_b = min(tile_b, half)
    if tile_b >= 8:
        tile_b = (tile_b // 8) * 8        # sublane alignment
    return max(1, tile_b)


def combiner_forward(z_t_1, u_t, h_rnn_1, h_rnn_2, prepared):
    """Pallas wrapper.

    z_t_1: (B, z_dim), u_t: (B, u_dim), h_rnn_1 / h_rnn_2: (B, rnn_dim).
    prepared: output of prepare_combiner_params (hoisted out of the hot path).
    Returns (loc, scale), each (B, z_dim).
    """
    wz, bzr, w_big, b_head = prepared
    B, z_dim = z_t_1.shape
    u_dim = u_t.shape[1]
    rnn_dim = h_rnn_1.shape[1]

    tile_b = _choose_tile_b(B, z_dim, u_dim, rnn_dim)
    grid = (pl.cdiv(B, tile_b),)

    def row_spec(d):
        return pl.BlockSpec((tile_b, d), lambda i: (i, 0))

    def full_spec(a):
        return pl.BlockSpec(a.shape, lambda i: (0,) * a.ndim)

    flops = 2 * B * (z_dim * rnn_dim + (rnn_dim + u_dim) * _HEAD_W)
    transcendentals = B * (rnn_dim + 2 * _HEAD_W)    # tanh + softplus exp/log1p
    bytes_accessed = 4 * (B * (z_dim + u_dim + 2 * rnn_dim + _HEAD_W)
                          + wz.size + bzr.size + w_big.size + b_head.size)

    out = pl.pallas_call(
        _combiner_kernel,
        out_shape=jax.ShapeDtypeStruct((B, _HEAD_W), jnp.float32),
        grid=grid,
        in_specs=[row_spec(z_dim), row_spec(u_dim),
                  row_spec(rnn_dim), row_spec(rnn_dim),
                  full_spec(wz), full_spec(bzr),
                  full_spec(w_big), full_spec(b_head)],
        out_specs=pl.BlockSpec((tile_b, _HEAD_W), lambda i: (i, 0)),
        compiler_params=pltpu.CompilerParams(
            dimension_semantics=("parallel",),
            vmem_limit_bytes=32 * 1024 * 1024),
        cost_estimate=pl.CostEstimate(flops=flops,
                                      transcendentals=transcendentals,
                                      bytes_accessed=bytes_accessed),
    )(z_t_1, u_t, h_rnn_1, h_rnn_2, wz, bzr, w_big, b_head)

    loc = out[:, :z_dim]
    scale = out[:, _SCALE_OFF:_SCALE_OFF + z_dim]
    return loc, scale


def init_params(key, z_dim, u_dim, rnn_dim):
    """Deterministic synthetic parameters (shapes match the nn.Module)."""
    ks = jax.random.split(key, 7)

    def lin(kw, kb, fan_in, fan_out):
        # uniform(-1/sqrt(fan_in), 1/sqrt(fan_in)), like nn.Linear default init
        bound = 1.0 / jnp.sqrt(fan_in)
        w = jax.random.uniform(kw, (fan_in, fan_out), jnp.float32, -bound, bound)
        b = jax.random.uniform(kb, (fan_out,), jnp.float32, -bound, bound)
        return w, b

    wz, bz = lin(ks[0], ks[1], z_dim, rnn_dim)    # lin_z_to_hidden
    wl, bl = lin(ks[2], ks[3], rnn_dim, z_dim)    # lin_hidden_to_loc
    ws, bs = lin(ks[4], ks[5], rnn_dim, z_dim)    # lin_hidden_to_scale
    bd_t = jax.random.normal(ks[6], (u_dim, z_dim), jnp.float32)  # Bd^T (lin_u_inf, frozen)
    return (wz, bz, wl, bl, ws, bs, bd_t)


def _reference(z_t_1, u_t, h_rnn_1, h_rnn_2, params):
    wz, bz, wl, bl, ws, bs, bd_t = params
    h_combined = (jnp.tanh(z_t_1 @ wz + bz) + h_rnn_1 + h_rnn_2) / 3.0
    hr = jax.nn.relu(h_combined)
    loc_ref = hr @ wl + bl + u_t @ bd_t
    scale_ref = jax.nn.softplus(hr @ ws + bs)
    return loc_ref, scale_ref


if __name__ == "__main__":
    z_dim, u_dim, rnn_dim = 4, 2, 32

    key = jax.random.PRNGKey(0)
    k_p, k_data = jax.random.split(key)
    params = init_params(k_p, z_dim, u_dim, rnn_dim)
    prepared = prepare_combiner_params(params)   # hoisted, once

    def run_case(kd, B):
        k_z, k_u, k_h1, k_h2 = jax.random.split(kd, 4)
        z_t_1 = jax.random.normal(k_z, (B, z_dim), jnp.float32)
        u_t = jax.random.normal(k_u, (B, u_dim), jnp.float32)
        h_rnn_1 = jax.random.normal(k_h1, (B, rnn_dim), jnp.float32)
        h_rnn_2 = jax.random.normal(k_h2, (B, rnn_dim), jnp.float32)

        loc, scale = combiner_forward(z_t_1, u_t, h_rnn_1, h_rnn_2, prepared)
        jax.block_until_ready((loc, scale))

        loc_ref, scale_ref = _reference(z_t_1, u_t, h_rnn_1, h_rnn_2, params)
        assert loc.shape == (B, z_dim) and scale.shape == (B, z_dim)
        assert jnp.allclose(loc, loc_ref, atol=1e-5, rtol=1e-5)
        assert jnp.allclose(scale, scale_ref, atol=1e-5, rtol=1e-5)

    kd1, kd2 = jax.random.split(k_data)
    run_case(kd1, B=8)    # single-step grid
    run_case(kd2, B=32)   # multi-step grid (pipelined / megacore-shardable)

    print("KERNEL_OK")
</pallas_src>

<mosaic_0001>
module attributes {stable_mosaic.version = 11 : i64} {
  func.func @_combiner_kernel(%arg0: i32, %arg1: memref<8x4xf32, #tpu.memory_space<vmem>>, %arg2: memref<8x2xf32, #tpu.memory_space<vmem>>, %arg3: memref<8x32xf32, #tpu.memory_space<vmem>>, %arg4: memref<8x32xf32, #tpu.memory_space<vmem>>, %arg5: memref<4x32xf32, #tpu.memory_space<vmem>>, %arg6: memref<1x32xf32, #tpu.memory_space<vmem>>, %arg7: memref<34x128xf32, #tpu.memory_space<vmem>>, %arg8: memref<1x128xf32, #tpu.memory_space<vmem>>, %arg9: memref<8x128xf32, #tpu.memory_space<vmem>>) attributes {dimension_semantics = [#tpu.dimension_semantics<parallel>], iteration_bounds = array<i64: 1>, scalar_prefetch = 0 : i64, scratch_operands = 0 : i64, tpu.core_type = #tpu.core_type<tc>, window_params = [{transform_indices = @transform_0, window_bounds = array<i64: 8, 4>}, {transform_indices = @transform_1, window_bounds = array<i64: 8, 2>}, {transform_indices = @transform_2, window_bounds = array<i64: 8, 32>}, {transform_indices = @transform_3, window_bounds = array<i64: 8, 32>}, {pipeline_mode = #tpu.pipeline_mode<synchronous>, transform_indices = @transform_4, window_bounds = array<i64: 4, 32>}, {pipeline_mode = #tpu.pipeline_mode<synchronous>, transform_indices = @transform_5, window_bounds = array<i64: 1, 32>}, {pipeline_mode = #tpu.pipeline_mode<synchronous>, transform_indices = @transform_6, window_bounds = array<i64: 34, 128>}, {pipeline_mode = #tpu.pipeline_mode<synchronous>, transform_indices = @transform_7, window_bounds = array<i64: 1, 128>}, {transform_indices = @transform_8, window_bounds = array<i64: 8, 128>}]} {
    %c0 = arith.constant 0 : index
    %c0_0 = arith.constant 0 : index
    %0 = vector.load %arg1[%c0, %c0_0] : memref<8x4xf32, #tpu.memory_space<vmem>>, vector<8x4xf32>
    %c0_1 = arith.constant 0 : index
    %c0_2 = arith.constant 0 : index
    %1 = vector.load %arg5[%c0_1, %c0_2] : memref<4x32xf32, #tpu.memory_space<vmem>>, vector<4x32xf32>
    %cst = arith.constant dense<0.000000e+00> : vector<8x32xf32>
    %2 = tpu.matmul %0, %1, %cst {dimension_numbers = #tpu.dot_dimension_numbers<[1], [0], [0], [1], [0, 0, 1, 1], [], []>} : vector<8x4xf32>, vector<4x32xf32>, vector<8x32xf32> -> vector<8x32xf32>
    %c0_3 = arith.constant 0 : index
    %c0_4 = arith.constant 0 : index
    %3 = vector.load %arg6[%c0_3, %c0_4] : memref<1x32xf32, #tpu.memory_space<vmem>>, vector<1x32xf32>
    %4 = vector.broadcast %3 : vector<1x32xf32> to vector<8x32xf32>
    %5 = arith.addf %2, %4 : vector<8x32xf32>
    %6 = math.tanh %5 : vector<8x32xf32>
    %c0_5 = arith.constant 0 : index
    %c0_6 = arith.constant 0 : index
    %7 = vector.load %arg3[%c0_5, %c0_6] : memref<8x32xf32, #tpu.memory_space<vmem>>, vector<8x32xf32>
    %8 = arith.addf %6, %7 : vector<8x32xf32>
    %c0_7 = arith.constant 0 : index
    %c0_8 = arith.constant 0 : index
    %9 = vector.load %arg4[%c0_7, %c0_8] : memref<8x32xf32, #tpu.memory_space<vmem>>, vector<8x32xf32>
    %10 = arith.addf %8, %9 : vector<8x32xf32>
    %cst_9 = arith.constant 0.333333343 : f32
    %11 = vector.broadcast %cst_9 : f32 to vector<8x32xf32>
    %12 = arith.mulf %10, %11 : vector<8x32xf32>
    %cst_10 = arith.constant 0.000000e+00 : f32
    %13 = vector.broadcast %cst_10 : f32 to vector<8x32xf32>
    %14 = arith.maximumf %12, %13 : vector<8x32xf32>
    %c0_11 = arith.constant 0 : index
    %c0_12 = arith.constant 0 : index
    %15 = vector.load %arg2[%c0_11, %c0_12] : memref<8x2xf32, #tpu.memory_space<vmem>>, vector<8x2xf32>
    %16 = tpu.concatenate %14, %15 in 1 : vector<8x32xf32>, vector<8x2xf32> -> vector<8x34xf32>
    %c0_13 = arith.constant 0 : index
    %c0_14 = arith.constant 0 : index
    %17 = vector.load %arg7[%c0_13, %c0_14] : memref<34x128xf32, #tpu.memory_space<vmem>>, vector<34x128xf32>
    %cst_15 = arith.constant dense<0.000000e+00> : vector<8x128xf32>
    %18 = tpu.matmul %16, %17, %cst_15 {dimension_numbers = #tpu.dot_dimension_numbers<[1], [0], [0], [1], [0, 0, 1, 1], [], []>} : vector<8x34xf32>, vector<34x128xf32>, vector<8x128xf32> -> vector<8x128xf32>
    %c0_16 = arith.constant 0 : index
    %c0_17 = arith.constant 0 : index
    %19 = vector.load %arg8[%c0_16, %c0_17] : memref<1x128xf32, #tpu.memory_space<vmem>>, vector<1x128xf32>
    %20 = vector.broadcast %19 : vector<1x128xf32> to vector<8x128xf32>
    %21 = arith.addf %18, %20 : vector<8x128xf32>
    %cst_18 = arith.constant 0.000000e+00 : f32
    %22 = vector.broadcast %cst_18 : f32 to vector<8x128xf32>
    %23 = arith.maximumf %21, %22 : vector<8x128xf32>
    %24 = math.absf %21 : vector<8x128xf32>
    %cst_19 = arith.constant 0.000000e+00 : f32
    %25 = vector.broadcast %cst_19 : f32 to vector<8x128xf32>
    %26 = arith.subf %25, %24 : vector<8x128xf32>
    %27 = math.exp %26 : vector<8x128xf32>
    %28 = math.log1p %27 : vector<8x128xf32>
    %29 = arith.addf %23, %28 : vector<8x128xf32>
    %30 = tpu.iota {dimensions = array<i32: 1>} : vector<8x128xi32>
    %c64_i32 = arith.constant 64 : i32
    %31 = vector.broadcast %c64_i32 : i32 to vector<8x128xi32>
    %32 = arith.cmpi sge, %30, %31 : vector<8x128xi32>
    %33 = arith.select %32, %29, %21 : vector<8x128xi1>, vector<8x128xf32>
    %c0_20 = arith.constant 0 : index
    %c0_21 = arith.constant 0 : index
    %34 = vector.load %arg9[%c0_20, %c0_21] : memref<8x128xf32, #tpu.memory_space<vmem>>, vector<8x128xf32>
    tpu.vector_store %arg9[%c0_20, %c0_21], %33 {strides = array<i32>} : memref<8x128xf32, #tpu.memory_space<vmem>>, vector<8x128xf32>,
    return
  }
  func.func @transform_0(%arg0: i32) -> (i32, i32) {
    %c0_i32 = arith.constant 0 : i32
    %c0_i32_0 = arith.constant 0 : i32
    return %arg0, %c0_i32 : i32, i32
  }
  func.func @transform_1(%arg0: i32) -> (i32, i32) {
    %c0_i32 = arith.constant 0 : i32
    %c0_i32_0 = arith.constant 0 : i32
    return %arg0, %c0_i32 : i32, i32
  }
  func.func @transform_2(%arg0: i32) -> (i32, i32) {
    %c0_i32 = arith.constant 0 : i32
    %c0_i32_0 = arith.constant 0 : i32
    return %arg0, %c0_i32 : i32, i32
  }
  func.func @transform_3(%arg0: i32) -> (i32, i32) {
    %c0_i32 = arith.constant 0 : i32
    %c0_i32_0 = arith.constant 0 : i32
    return %arg0, %c0_i32 : i32, i32
  }
  func.func @transform_4(%arg0: i32) -> (i32, i32) {
    %c0_i32 = arith.constant 0 : i32
    %c0_i32_0 = arith.constant 0 : i32
    %c0_i32_1 = arith.constant 0 : i32
    return %c0_i32, %c0_i32_0 : i32, i32
  }
  func.func @transform_5(%arg0: i32) -> (i32, i32) {
    %c0_i32 = arith.constant 0 : i32
    %c0_i32_0 = arith.constant 0 : i32
    %c0_i32_1 = arith.constant 0 : i32
    return %c0_i32, %c0_i32_0 : i32, i32
  }
  func.func @transform_6(%arg0: i32) -> (i32, i32) {
    %c0_i32 = arith.constant 0 : i32
    %c0_i32_0 = arith.constant 0 : i32
    %c0_i32_1 = arith.constant 0 : i32
    return %c0_i32, %c0_i32_0 : i32, i32
  }
  func.func @transform_7(%arg0: i32) -> (i32, i32) {
    %c0_i32 = arith.constant 0 : i32
    %c0_i32_0 = arith.constant 0 : i32
    %c0_i32_1 = arith.constant 0 : i32
    return %c0_i32, %c0_i32_0 : i32, i32
  }
  func.func @transform_8(%arg0: i32) -> (i32, i32) {
    %c0_i32 = arith.constant 0 : i32
    %c0_i32_0 = arith.constant 0 : i32
    return %arg0, %c0_i32 : i32, i32
  }
}

</mosaic_0001>

<bundles_post_ra>
// kernel: tpu_custom_call.1
= control target key start
LH: loop header
LB: loop body
LE: loop exit
PB: predicated region body
PF: predicated region fallthrough
CT: control target
= control target key end

     0   :  { %13 = vsyncpa [#allocation3], 0  ;;  %s314_s0 = inlined_call_operand.vmem [shape: f32[8,4], index: 0, kind: input, shape index: {}]   ;;  %s315_s1 = inlined_call_operand.vmem [shape: f32[8,2], index: 1, kind: input, shape index: {}]   ;;  %s316_s2 = inlined_call_operand.vmem [shape: f32[8,32], index: 2, kind: input, shape index: {}]   ;;  %s317_s3 = inlined_call_operand.vmem [shape: f32[8,32], index: 3, kind: input, shape index: {}]   ;;  %s318_s4 = inlined_call_operand.vmem [shape: f32[4,32], index: 4, kind: input, shape index: {}]   ;;  %s319_s5 = inlined_call_operand.vmem [shape: f32[1,32], index: 5, kind: input, shape index: {}]   ;;  %s320_s6 = inlined_call_operand.hbm [shape: f32[34,128], index: 6, kind: input, shape index: {}]   ;;  %s321_s7 = inlined_call_operand.vmem [shape: f32[1,128], index: 7, kind: input, shape index: {}]   ;;  %s322_s8 = inlined_call_operand.hbm [shape: f32[8,128], index: 8, kind: output, shape index: {}]  }
   0x1   :  { %14 = vsyncpa [#allocation4], 0  ;;  %s31_s29 = sshll.u32 %s320_s6, 4  ;;  %s237_s30 = smov [#allocation2]   ;;  %s32_s29 = int_to_ptr.hbm [resolvable:$true] %s31_s29 }
   0x2   :  { %s33_s9 = sshll.u32 %s237_s30, 4  ;;  %s238_s10 = smov 128   ;;  %s34_s9 = int_to_ptr.vmem [resolvable:$true] %s33_s9 }
   0x3   :  { %s239_s11 = smov 8  }
   0x4   :  { %39 = dma.hbm_to_vmem [thread:$0]  %s32_s29, 640, %s34_s9, [#allocation3], %s238_s10, %s238_s10, %s239_s11  }
   0x5   :  { %233 = dma.done.wait [#allocation3], 640  }
   0x6   :  { %234 = vsyncadd [#allocation3], 4294966656  ;;  %vm56_vm0 = vcmask 1043456   ;;  %vm52_vm1 = vcmask 31744   ;;  %v47_v0 = vld [vmem:[%s318_s4] sm:$0xf]  ;;  %v146_v29 = vlaneseq }
   0x7   :  { %v46_v1 = vld [vmem:[%s314_s0] sm:$0xff]  ;;  %168 = vmatpush.msk.msra.mxu0 %vm56_vm0, %v47_v0  ;;  %s240_s17 = smov 32   ;;  %vm107_vm2 = vcmask 1041408   ;;  %v97_v4 = vld [vmem:[#allocation2 + $0x18] sm:$0xff]  ;;  %v96_v5 = vld [vmem:[#allocation2 + $0x10] sm:$0xff]  ;;  %vm92_vm3 = vcmask 261120  }
   0x8   :  { %v87_v2 = vld [vmem:[%s315_s1] sm:$0xff]  ;;  %169 = vmatmul.msk.f32.vlgmr.msra.gmra.mxu0 %vm52_vm1, %v46_v1  ;;  %v95_v6 = vld [vmem:[#allocation2 + $0x8] sm:$0xff]  ;;  %vm103_vm4 = vcmask 277504   ;;  %v147_v32 = vand.u32 127, %v146_v29  ;;  %s158_s23 = sshll.u32 %s322_s8, 4  ;;  %s159_s23 = int_to_ptr.hbm [resolvable:$true] %s158_s23 }
   0x9   :  { %89 = vrot.lane.b32.xlu0 %v87_v2, %s240_s17  ;;  %v98_v3 = vld [vmem:[#allocation2 + $0x20] sm:$0x3] }
   0xa   :  { %170 = vmatpush.msk.msra.mxu1 %vm107_vm2, %v98_v3  ;;  %v94_v7 = vld [vmem:[#allocation2] sm:$0xff]  ;;  %vm148_vm6 = vcmp.ge.s32.totalorder %v147_v32, 64 }
   0xb   :  { %v177_v8 = vld [vmem:[%s319_s5] ss:$0 sm:$0xff] }
   0xc   :  { %123 = vmatpush.msra.mxu1 %v97_v4  ;;  %v81_v11 = vld [vmem:[%s316_s2] sm:$0xff]  ;;  %s241_s2 = smov [#allocation5]  }
   0xd   :  { %v83_v13 = vld [vmem:[%s317_s3] sm:$0xff]  ;;  %s156_s3 = sshll.u32 %s241_s2, 4  ;;  %s157_s3 = int_to_ptr.vmem [resolvable:$true] %s156_s3 }
   0xe   :  { %124 = vmatpush.msra.mxu1 %v96_v5  ;;  %v178_v20 = vld [vmem:[%s321_s7] ss:$0 sm:$0xff] }
  0x10   :  { %125 = vmatpush.msra.mxu1 %v95_v6 }
  0x12   :  { %126 = vmatpush.msra.mxu1 %v94_v7 }
  0x7b   :  { %v90_v17 = vpop.permute.xlu0 %89 }
  0x85   :  { %v77_v9 = vpop.f32.mrf.mxu0 }
  0x86   :  { %v78_v10 = vadd.f32 %v177_v8, %v77_v9 }
  0x88   :  { %179 = vtanh.f32 %v78_v10 }
  0x8e   :  { %v180_v12 = vpop.eup %179 }
  0x8f   :  { %v82_v14 = vadd.f32 %v180_v12, %v81_v11 }
  0x91   :  { %v84_v15 = vadd.f32 %v83_v13, %v82_v14 }
  0x93   :  { %v85_v16 = vmul.f32 0.33333334, %v84_v15 }
  0x95   :  { %v86_v18 = vmax.f32 %v85_v16, 0.0 }
  0x97   :  { %v93_v19 = vsel %vm92_vm3, %v86_v18, %v90_v17 }
  0x98   :  { %171 = vmatmul.msk.f32.vlgmr.msra.gmra.mxu1 %vm103_vm4, %v93_v19 }
 0x115   :  { %v128_v21 = vpop.f32.mrf.mxu1 }
 0x116   :  { %v129_v22 = vadd.f32 %v178_v20, %v128_v21 }
 0x118   :  { %v132_v23 = vand.u32 2147483647, %v129_v22  ;;  %v131_v36 = vmax.f32 %v129_v22, 0.0 }
 0x11a   :  { %v133_v24 = vsub.f32 0.0, %v132_v23 }
 0x11c   :  { %v134_v25 = vmul.f32 1.442695, %v133_v24 }
 0x11e   :  { %181 = vpow2.f32 %v134_v25 }
 0x124   :  { %v182_v26 = vpop.eup %181 }
 0x125   :  { %v136_v27 = vadd.f32 1.0, %v182_v26  ;;  %v139_v28 = vmul.f32 -0.5, %v182_v26  ;;  %v142_v31 = vand.u32 2147483647, %v182_v26 }
 0x127   :  { %183 = vlog2.f32 %v136_v27  ;;  %v140_v30 = vadd.f32 1.0, %v139_v28  ;;  %vm143_vm5 = vcmp.lt.f32.partialorder %v142_v31, 0.0004427343 }
 0x129   :  { %v141_v35 = vmul.f32 %v182_v26, %v140_v30 }
 0x12d   :  { %v184_v33 = vpop.eup %183 }
 0x12e   :  { %v138_v34 = vmul.f32 0.6931472, %v184_v33 }
 0x130   :  { %v144_v37 = vsel %vm143_vm5, %v141_v35, %v138_v34 }
 0x131   :  { %v145_v38 = vadd.f32 %v144_v37, %v131_v36 }
 0x133   :  { %v149_v39 = vsel %vm148_vm6, %v145_v38, %v129_v22 }
 0x134   :  { %150 = vst [vmem:[#allocation5] sm:$0xff] %v149_v39 }
 0x135   :  { %161 = dma.vmem_to_hbm [thread:$0]  %s157_s3, 128, %s159_s23, [#allocation4]  }
 0x136   :  { %235 = dma.done.wait [#allocation4], 128  }
 0x137   :  { %236 = vsyncadd [#allocation4], 4294967168 }
 0x138   :  { %166 = vsyncpa [#allocation3], 1 }
 0x139   :  { %167 = vsyncpa [#allocation4], 1 }

</bundles_post_ra>
